<compile_context>
chip_gen: v7x
topology: tpu7x:2x2x1
jax: 0.10.0
libtpu: 0.0.40
codegen_flags: <defaults>
</compile_context>

<pallas_src>
import jax
import jax.numpy as jnp
from jax.experimental import pallas as pl
from jax.experimental.pallas import tpu as pltpu


# ----------------------------- fused BiLSTM + fc kernel -----------------------------
def _bilstm_kernel(x_ref, h0_ref, c0_ref, wih_f_ref, wih_b_ref,
                   whh_f_ref, whh_b_ref, b_f_ref, b_b_ref,
                   fcw_ref, fcb_ref, out_ref, gxf_ref):
    """Fused bidirectional LSTM + fc head.

    x_ref:     (T*Bp, C)   time-major input, batch padded to Bp, flattened
    h0_ref:    (2, Bp, H)  initial hidden states [fwd, bwd]
    c0_ref:    (2, Bp, H)  initial cell states   [fwd, bwd]
    wih_f_ref: (C, 4H)     forward  input->gate weights, gate order [i, f, o, g]
    wih_b_ref: (C, 4H)     backward input->gate weights
    whh_f_ref: (H, 4H)     forward  hidden->gate weights
    whh_b_ref: (H, 4H)     backward hidden->gate weights
    b_f_ref:   (1, 4H)     forward  combined bias (b_ih + b_hh)
    b_b_ref:   (1, 4H)     backward combined bias
    fcw_ref:   (2H, N)     fc weight (pre-transposed); rows [fwd H | bwd H]
    fcb_ref:   (1, N)      fc bias
    out_ref:   (Bp, N)     fc(outputs[-1])
    gxf_ref:   (T*Bp, 4H)  scratch: hoisted forward-direction input projection
    """
    Bp = h0_ref.shape[1]
    H = whh_f_ref.shape[0]
    T = x_ref.shape[0] // Bp

    # --- Hoisted FORWARD input projection: one big MXU matmul for all steps ---
    gxf_ref[...] = (jnp.dot(x_ref[...], wih_f_ref[...],
                            preferred_element_type=jnp.float32) + b_f_ref[...])

    def cell(gates, c_prev):
        # gate order [i, f, o, g]: one sigmoid over a contiguous 3H slice
        ifo = jax.nn.sigmoid(gates[:, :3 * H])
        g_g = jnp.tanh(gates[:, 3 * H:])
        i_g = ifo[:, :H]
        f_g = ifo[:, H:2 * H]
        o_g = ifo[:, 2 * H:3 * H]
        c_new = f_g * c_prev + i_g * g_g
        h_new = o_g * jnp.tanh(c_new)
        return h_new, c_new

    # --- Forward recurrence: h/c carried in vregs, loop fully unrolled ---
    def step(t, carry):
        h_prev, c_prev = carry
        start = pl.multiple_of(t * Bp, Bp)
        gates = gxf_ref[pl.ds(start, Bp), :] + jnp.dot(
            h_prev, whh_f_ref[...], preferred_element_type=jnp.float32)
        return cell(gates, c_prev)

    h_f, _ = jax.lax.fori_loop(0, T, step, (h0_ref[0], c0_ref[0]), unroll=True)

    # --- Backward direction: outputs[-1][:, H:] is the backward hidden at the
    #     original time index T-1 == its first recurrence step, so exactly one
    #     cell step on x[T-1] from (h0_bwd, c0_bwd) is required. ---
    x_last = x_ref[(T - 1) * Bp:, :]                          # static (Bp, C)
    gates_b = (jnp.dot(x_last, wih_b_ref[...], preferred_element_type=jnp.float32)
               + jnp.dot(h0_ref[1], whh_b_ref[...],
                         preferred_element_type=jnp.float32)
               + b_b_ref[...])
    h_b, _ = cell(gates_b, c0_ref[1])

    # --- Fused fc head: split the weight rows instead of lane-concatenating ---
    out = (jnp.dot(h_f, fcw_ref[:H, :], preferred_element_type=jnp.float32)
           + jnp.dot(h_b, fcw_ref[H:, :], preferred_element_type=jnp.float32)
           + fcb_ref[...])
    out_ref[...] = out.astype(out_ref.dtype)


def bilstm_forward(params, x, h0, c0):
    """x: (B, T, C) float32; h0, c0: (2, B, H). Returns (B, n_class)."""
    B, T, C = x.shape
    H = params["whh_f"].shape[0]
    n_class = params["fc_w"].shape[1]
    Bp = ((B + 7) // 8) * 8  # pad batch to a sublane multiple for aligned slices

    x_tm = jnp.transpose(x, (1, 0, 2))                        # (T, B, C) time-major
    x_tm = jnp.pad(x_tm, ((0, 0), (0, Bp - B), (0, 0)))
    x_flat = x_tm.reshape(T * Bp, C)
    h0_p = jnp.pad(h0, ((0, 0), (0, Bp - B), (0, 0)))
    c0_p = jnp.pad(c0, ((0, 0), (0, Bp - B), (0, 0)))

    vmem = pl.BlockSpec(memory_space=pltpu.MemorySpace.VMEM)
    out = pl.pallas_call(
        _bilstm_kernel,
        out_shape=jax.ShapeDtypeStruct((Bp, n_class), jnp.float32),
        in_specs=[vmem] * 11,
        out_specs=vmem,
        scratch_shapes=[pltpu.VMEM((T * Bp, 4 * H), jnp.float32)],
    )(x_flat, h0_p, c0_p,
      params["wih_f"], params["wih_b"],
      params["whh_f"], params["whh_b"],
      params["b_f"], params["b_b"],
      params["fc_w"], params["fc_b"])
    return out[:B]


# ----------------------------- parameter init (deterministic) -----------------------------
def init_bilstm_params(key, n_class, n_hidden):
    """PyTorch-style default init: LSTM params ~ U(-1/sqrt(H), 1/sqrt(H)),
    fc ~ U(-1/sqrt(2H), 1/sqrt(2H)). Weights are pre-transposed to [in, out]
    with gate column order [i, f, o, g]; per-direction biases pre-summed."""
    H = n_hidden
    keys = jax.random.split(key, 10)
    k = H ** -0.5

    def u(kk, shape, bound):
        return jax.random.uniform(kk, shape, jnp.float32, -bound, bound)

    wih_f = u(keys[0], (n_class, 4 * H), k)
    whh_f = u(keys[1], (H, 4 * H), k)
    bih_f = u(keys[2], (1, 4 * H), k)
    bhh_f = u(keys[3], (1, 4 * H), k)
    wih_b = u(keys[4], (n_class, 4 * H), k)
    whh_b = u(keys[5], (H, 4 * H), k)
    bih_b = u(keys[6], (1, 4 * H), k)
    bhh_b = u(keys[7], (1, 4 * H), k)

    kf = (2 * H) ** -0.5
    fc_w = u(keys[8], (2 * H, n_class), kf)
    fc_b = u(keys[9], (1, n_class), kf)

    return {
        "wih_f": wih_f,                # (C, 4H)
        "wih_b": wih_b,                # (C, 4H)
        "whh_f": whh_f,                # (H, 4H)
        "whh_b": whh_b,                # (H, 4H)
        "b_f": bih_f + bhh_f,          # (1, 4H)
        "b_b": bih_b + bhh_b,          # (1, 4H)
        "fc_w": fc_w,                  # (2H, N)
        "fc_b": fc_b,                  # (1, N)
    }


# ----------------------------- pure-JAX reference (full BiLSTM) -----------------------------
def bilstm_ref(params, x, h0, c0):
    B, T, C = x.shape
    H = params["whh_f"].shape[0]

    def cell(x_t, h, c, w_ih, w_hh, b):
        gates = x_t @ w_ih + h @ w_hh + b
        i = jax.nn.sigmoid(gates[:, :H])
        f = jax.nn.sigmoid(gates[:, H:2 * H])
        o = jax.nn.sigmoid(gates[:, 2 * H:3 * H])
        g = jnp.tanh(gates[:, 3 * H:])
        c_new = f * c + i * g
        return o * jnp.tanh(c_new), c_new

    h, c = h0[0], c0[0]
    outs_f = []
    for t in range(T):
        h, c = cell(x[:, t], h, c, params["wih_f"], params["whh_f"], params["b_f"])
        outs_f.append(h)

    h, c = h0[1], c0[1]
    outs_b = [None] * T
    for t in range(T - 1, -1, -1):
        h, c = cell(x[:, t], h, c, params["wih_b"], params["whh_b"], params["b_b"])
        outs_b[t] = h

    last = jnp.concatenate([outs_f[-1], outs_b[-1]], axis=1)   # outputs[-1]
    return last @ params["fc_w"] + params["fc_b"]


if __name__ == "__main__":
    n_class = 16
    n_hidden = 32
    batch = 2
    seq = 8

    key = jax.random.PRNGKey(0)
    kp, kx, kh, kc = jax.random.split(key, 4)
    params = init_bilstm_params(kp, n_class, n_hidden)
    x = jax.random.normal(kx, (batch, seq, n_class), jnp.float32)
    # TODO(synk): the torch module draws torch.randn initial states inside
    # forward (non-deterministic); here they are deterministic inputs.
    h0 = jax.random.normal(kh, (2, batch, n_hidden), jnp.float32)
    c0 = jax.random.normal(kc, (2, batch, n_hidden), jnp.float32)

    out = bilstm_forward(params, x, h0, c0)
    jax.block_until_ready(out)
    assert out.shape == (batch, n_class)

    ref = bilstm_ref(params, x, h0, c0)
    err = float(jnp.max(jnp.abs(out - ref)))
    assert err < 1e-3, f"mismatch vs pure-JAX reference: {err}"
    print("KERNEL_OK")
</pallas_src>

<mosaic_0001>
module attributes {stable_mosaic.version = 11 : i64} {
  func.func @_bilstm_kernel(%arg0: memref<64x16xf32, #tpu.memory_space<vmem>>, %arg1: memref<2x8x32xf32, #tpu.memory_space<vmem>>, %arg2: memref<2x8x32xf32, #tpu.memory_space<vmem>>, %arg3: memref<16x128xf32, #tpu.memory_space<vmem>>, %arg4: memref<16x128xf32, #tpu.memory_space<vmem>>, %arg5: memref<32x128xf32, #tpu.memory_space<vmem>>, %arg6: memref<32x128xf32, #tpu.memory_space<vmem>>, %arg7: memref<1x128xf32, #tpu.memory_space<vmem>>, %arg8: memref<1x128xf32, #tpu.memory_space<vmem>>, %arg9: memref<64x16xf32, #tpu.memory_space<vmem>>, %arg10: memref<1x16xf32, #tpu.memory_space<vmem>>, %arg11: memref<8x16xf32, #tpu.memory_space<vmem>>, %arg12: memref<64x128xf32, #tpu.memory_space<vmem>>) attributes {dimension_semantics = [], scalar_prefetch = 0 : i64, scratch_operands = 1 : i64, tpu.core_type = #tpu.core_type<tc>} {
    %c0 = arith.constant 0 : index
    %c0_0 = arith.constant 0 : index
    %0 = vector.load %arg0[%c0, %c0_0] : memref<64x16xf32, #tpu.memory_space<vmem>>, vector<64x16xf32>
    %c0_1 = arith.constant 0 : index
    %c0_2 = arith.constant 0 : index
    %1 = vector.load %arg3[%c0_1, %c0_2] : memref<16x128xf32, #tpu.memory_space<vmem>>, vector<16x128xf32>
    %cst = arith.constant dense<0.000000e+00> : vector<64x128xf32>
    %2 = tpu.matmul %0, %1, %cst {dimension_numbers = #tpu.dot_dimension_numbers<[1], [0], [0], [1], [0, 0, 1, 1], [], []>} : vector<64x16xf32>, vector<16x128xf32>, vector<64x128xf32> -> vector<64x128xf32>
    %c0_3 = arith.constant 0 : index
    %c0_4 = arith.constant 0 : index
    %3 = vector.load %arg7[%c0_3, %c0_4] : memref<1x128xf32, #tpu.memory_space<vmem>>, vector<1x128xf32>
    %4 = vector.broadcast %3 : vector<1x128xf32> to vector<64x128xf32>
    %5 = arith.addf %2, %4 : vector<64x128xf32>
    %c0_5 = arith.constant 0 : index
    %c0_6 = arith.constant 0 : index
    %6 = vector.load %arg12[%c0_5, %c0_6] : memref<64x128xf32, #tpu.memory_space<vmem>>, vector<64x128xf32>
    tpu.vector_store %arg12[%c0_5, %c0_6], %5 {strides = array<i32>} : memref<64x128xf32, #tpu.memory_space<vmem>>, vector<64x128xf32>,
    %c0_7 = arith.constant 0 : index
    %c0_8 = arith.constant 0 : index
    %c0_9 = arith.constant 0 : index
    %7 = vector.load %arg1[%c0_7, %c0_8, %c0_9] : memref<2x8x32xf32, #tpu.memory_space<vmem>>, vector<1x8x32xf32>
    %8 = vector.shape_cast %7 : vector<1x8x32xf32> to vector<8x32xf32>
    %c0_10 = arith.constant 0 : index
    %c0_11 = arith.constant 0 : index
    %c0_12 = arith.constant 0 : index
    %9 = vector.load %arg2[%c0_10, %c0_11, %c0_12] : memref<2x8x32xf32, #tpu.memory_space<vmem>>, vector<1x8x32xf32>
    %10 = vector.shape_cast %9 : vector<1x8x32xf32> to vector<8x32xf32>
    %c0_i32 = arith.constant 0 : i32
    %c8_i32 = arith.constant 8 : i32
    %11 = arith.muli %c0_i32, %c8_i32 : i32
    %12 = tpu.assume_multiple %11, 8 : i32
    %13 = arith.index_cast %12 : i32 to index
    %c0_13 = arith.constant 0 : index
    %14 = vector.load %arg12[%13, %c0_13] : memref<64x128xf32, #tpu.memory_space<vmem>>, vector<8x128xf32>
    %c0_14 = arith.constant 0 : index
    %c0_15 = arith.constant 0 : index
    %15 = vector.load %arg5[%c0_14, %c0_15] : memref<32x128xf32, #tpu.memory_space<vmem>>, vector<32x128xf32>
    %cst_16 = arith.constant dense<0.000000e+00> : vector<8x128xf32>
    %16 = tpu.matmul %8, %15, %cst_16 {dimension_numbers = #tpu.dot_dimension_numbers<[1], [0], [0], [1], [0, 0, 1, 1], [], []>} : vector<8x32xf32>, vector<32x128xf32>, vector<8x128xf32> -> vector<8x128xf32>
    %17 = arith.addf %14, %16 : vector<8x128xf32>
    %18 = vector.extract_strided_slice %17 {offsets = [0, 0], sizes = [8, 96], strides = [1, 1]} : vector<8x128xf32> to vector<8x96xf32>
    %19 = arith.negf %18 : vector<8x96xf32>
    %20 = math.exp %19 : vector<8x96xf32>
    %cst_17 = arith.constant 1.000000e+00 : f32
    %21 = vector.broadcast %cst_17 : f32 to vector<8x96xf32>
    %22 = arith.addf %21, %20 : vector<8x96xf32>
    %23 = arith.divf %21, %22 : vector<8x96xf32>
    %24 = vector.extract_strided_slice %17 {offsets = [0, 96], sizes = [8, 32], strides = [1, 1]} : vector<8x128xf32> to vector<8x32xf32>
    %25 = math.tanh %24 : vector<8x32xf32>
    %26 = vector.extract_strided_slice %23 {offsets = [0, 0], sizes = [8, 32], strides = [1, 1]} : vector<8x96xf32> to vector<8x32xf32>
    %27 = vector.extract_strided_slice %23 {offsets = [0, 32], sizes = [8, 32], strides = [1, 1]} : vector<8x96xf32> to vector<8x32xf32>
    %28 = vector.extract_strided_slice %23 {offsets = [0, 64], sizes = [8, 32], strides = [1, 1]} : vector<8x96xf32> to vector<8x32xf32>
    %29 = arith.mulf %27, %10 : vector<8x32xf32>
    %30 = arith.mulf %26, %25 : vector<8x32xf32>
    %31 = arith.addf %29, %30 : vector<8x32xf32>
    %32 = math.tanh %31 : vector<8x32xf32>
    %33 = arith.mulf %28, %32 : vector<8x32xf32>
    %c1_i32 = arith.constant 1 : i32
    %c8_i32_18 = arith.constant 8 : i32
    %34 = arith.muli %c1_i32, %c8_i32_18 : i32
    %35 = tpu.assume_multiple %34, 8 : i32
    %36 = arith.index_cast %35 : i32 to index
    %c0_19 = arith.constant 0 : index
    %37 = vector.load %arg12[%36, %c0_19] : memref<64x128xf32, #tpu.memory_space<vmem>>, vector<8x128xf32>
    %c0_20 = arith.constant 0 : index
    %c0_21 = arith.constant 0 : index
    %38 = vector.load %arg5[%c0_20, %c0_21] : memref<32x128xf32, #tpu.memory_space<vmem>>, vector<32x128xf32>
    %cst_22 = arith.constant dense<0.000000e+00> : vector<8x128xf32>
    %39 = tpu.matmul %33, %38, %cst_22 {dimension_numbers = #tpu.dot_dimension_numbers<[1], [0], [0], [1], [0, 0, 1, 1], [], []>} : vector<8x32xf32>, vector<32x128xf32>, vector<8x128xf32> -> vector<8x128xf32>
    %40 = arith.addf %37, %39 : vector<8x128xf32>
    %41 = vector.extract_strided_slice %40 {offsets = [0, 0], sizes = [8, 96], strides = [1, 1]} : vector<8x128xf32> to vector<8x96xf32>
    %42 = arith.negf %41 : vector<8x96xf32>
    %43 = math.exp %42 : vector<8x96xf32>
    %cst_23 = arith.constant 1.000000e+00 : f32
    %44 = vector.broadcast %cst_23 : f32 to vector<8x96xf32>
    %45 = arith.addf %44, %43 : vector<8x96xf32>
    %46 = arith.divf %44, %45 : vector<8x96xf32>
    %47 = vector.extract_strided_slice %40 {offsets = [0, 96], sizes = [8, 32], strides = [1, 1]} : vector<8x128xf32> to vector<8x32xf32>
    %48 = math.tanh %47 : vector<8x32xf32>
    %49 = vector.extract_strided_slice %46 {offsets = [0, 0], sizes = [8, 32], strides = [1, 1]} : vector<8x96xf32> to vector<8x32xf32>
    %50 = vector.extract_strided_slice %46 {offsets = [0, 32], sizes = [8, 32], strides = [1, 1]} : vector<8x96xf32> to vector<8x32xf32>
    %51 = vector.extract_strided_slice %46 {offsets = [0, 64], sizes = [8, 32], strides = [1, 1]} : vector<8x96xf32> to vector<8x32xf32>
    %52 = arith.mulf %50, %31 : vector<8x32xf32>
    %53 = arith.mulf %49, %48 : vector<8x32xf32>
    %54 = arith.addf %52, %53 : vector<8x32xf32>
    %55 = math.tanh %54 : vector<8x32xf32>
    %56 = arith.mulf %51, %55 : vector<8x32xf32>
    %c2_i32 = arith.constant 2 : i32
    %c8_i32_24 = arith.constant 8 : i32
    %57 = arith.muli %c2_i32, %c8_i32_24 : i32
    %58 = tpu.assume_multiple %57, 8 : i32
    %59 = arith.index_cast %58 : i32 to index
    %c0_25 = arith.constant 0 : index
    %60 = vector.load %arg12[%59, %c0_25] : memref<64x128xf32, #tpu.memory_space<vmem>>, vector<8x128xf32>
    %c0_26 = arith.constant 0 : index
    %c0_27 = arith.constant 0 : index
    %61 = vector.load %arg5[%c0_26, %c0_27] : memref<32x128xf32, #tpu.memory_space<vmem>>, vector<32x128xf32>
    %cst_28 = arith.constant dense<0.000000e+00> : vector<8x128xf32>
    %62 = tpu.matmul %56, %61, %cst_28 {dimension_numbers = #tpu.dot_dimension_numbers<[1], [0], [0], [1], [0, 0, 1, 1], [], []>} : vector<8x32xf32>, vector<32x128xf32>, vector<8x128xf32> -> vector<8x128xf32>
    %63 = arith.addf %60, %62 : vector<8x128xf32>
    %64 = vector.extract_strided_slice %63 {offsets = [0, 0], sizes = [8, 96], strides = [1, 1]} : vector<8x128xf32> to vector<8x96xf32>
    %65 = arith.negf %64 : vector<8x96xf32>
    %66 = math.exp %65 : vector<8x96xf32>
    %cst_29 = arith.constant 1.000000e+00 : f32
    %67 = vector.broadcast %cst_29 : f32 to vector<8x96xf32>
    %68 = arith.addf %67, %66 : vector<8x96xf32>
    %69 = arith.divf %67, %68 : vector<8x96xf32>
    %70 = vector.extract_strided_slice %63 {offsets = [0, 96], sizes = [8, 32], strides = [1, 1]} : vector<8x128xf32> to vector<8x32xf32>
    %71 = math.tanh %70 : vector<8x32xf32>
    %72 = vector.extract_strided_slice %69 {offsets = [0, 0], sizes = [8, 32], strides = [1, 1]} : vector<8x96xf32> to vector<8x32xf32>
    %73 = vector.extract_strided_slice %69 {offsets = [0, 32], sizes = [8, 32], strides = [1, 1]} : vector<8x96xf32> to vector<8x32xf32>
    %74 = vector.extract_strided_slice %69 {offsets = [0, 64], sizes = [8, 32], strides = [1, 1]} : vector<8x96xf32> to vector<8x32xf32>
    %75 = arith.mulf %73, %54 : vector<8x32xf32>
    %76 = arith.mulf %72, %71 : vector<8x32xf32>
    %77 = arith.addf %75, %76 : vector<8x32xf32>
    %78 = math.tanh %77 : vector<8x32xf32>
    %79 = arith.mulf %74, %78 : vector<8x32xf32>
    %c3_i32 = arith.constant 3 : i32
    %c8_i32_30 = arith.constant 8 : i32
    %80 = arith.muli %c3_i32, %c8_i32_30 : i32
    %81 = tpu.assume_multiple %80, 8 : i32
    %82 = arith.index_cast %81 : i32 to index
    %c0_31 = arith.constant 0 : index
    %83 = vector.load %arg12[%82, %c0_31] : memref<64x128xf32, #tpu.memory_space<vmem>>, vector<8x128xf32>
    %c0_32 = arith.constant 0 : index
    %c0_33 = arith.constant 0 : index
    %84 = vector.load %arg5[%c0_32, %c0_33] : memref<32x128xf32, #tpu.memory_space<vmem>>, vector<32x128xf32>
    %cst_34 = arith.constant dense<0.000000e+00> : vector<8x128xf32>
    %85 = tpu.matmul %79, %84, %cst_34 {dimension_numbers = #tpu.dot_dimension_numbers<[1], [0], [0], [1], [0, 0, 1, 1], [], []>} : vector<8x32xf32>, vector<32x128xf32>, vector<8x128xf32> -> vector<8x128xf32>
    %86 = arith.addf %83, %85 : vector<8x128xf32>
    %87 = vector.extract_strided_slice %86 {offsets = [0, 0], sizes = [8, 96], strides = [1, 1]} : vector<8x128xf32> to vector<8x96xf32>
    %88 = arith.negf %87 : vector<8x96xf32>
    %89 = math.exp %88 : vector<8x96xf32>
    %cst_35 = arith.constant 1.000000e+00 : f32
    %90 = vector.broadcast %cst_35 : f32 to vector<8x96xf32>
    %91 = arith.addf %90, %89 : vector<8x96xf32>
    %92 = arith.divf %90, %91 : vector<8x96xf32>
    %93 = vector.extract_strided_slice %86 {offsets = [0, 96], sizes = [8, 32], strides = [1, 1]} : vector<8x128xf32> to vector<8x32xf32>
    %94 = math.tanh %93 : vector<8x32xf32>
    %95 = vector.extract_strided_slice %92 {offsets = [0, 0], sizes = [8, 32], strides = [1, 1]} : vector<8x96xf32> to vector<8x32xf32>
    %96 = vector.extract_strided_slice %92 {offsets = [0, 32], sizes = [8, 32], strides = [1, 1]} : vector<8x96xf32> to vector<8x32xf32>
    %97 = vector.extract_strided_slice %92 {offsets = [0, 64], sizes = [8, 32], strides = [1, 1]} : vector<8x96xf32> to vector<8x32xf32>
    %98 = arith.mulf %96, %77 : vector<8x32xf32>
    %99 = arith.mulf %95, %94 : vector<8x32xf32>
    %100 = arith.addf %98, %99 : vector<8x32xf32>
    %101 = math.tanh %100 : vector<8x32xf32>
    %102 = arith.mulf %97, %101 : vector<8x32xf32>
    %c4_i32 = arith.constant 4 : i32
    %c8_i32_36 = arith.constant 8 : i32
    %103 = arith.muli %c4_i32, %c8_i32_36 : i32
    %104 = tpu.assume_multiple %103, 8 : i32
    %105 = arith.index_cast %104 : i32 to index
    %c0_37 = arith.constant 0 : index
    %106 = vector.load %arg12[%105, %c0_37] : memref<64x128xf32, #tpu.memory_space<vmem>>, vector<8x128xf32>
    %c0_38 = arith.constant 0 : index
    %c0_39 = arith.constant 0 : index
    %107 = vector.load %arg5[%c0_38, %c0_39] : memref<32x128xf32, #tpu.memory_space<vmem>>, vector<32x128xf32>
    %cst_40 = arith.constant dense<0.000000e+00> : vector<8x128xf32>
    %108 = tpu.matmul %102, %107, %cst_40 {dimension_numbers = #tpu.dot_dimension_numbers<[1], [0], [0], [1], [0, 0, 1, 1], [], []>} : vector<8x32xf32>, vector<32x128xf32>, vector<8x128xf32> -> vector<8x128xf32>
    %109 = arith.addf %106, %108 : vector<8x128xf32>
    %110 = vector.extract_strided_slice %109 {offsets = [0, 0], sizes = [8, 96], strides = [1, 1]} : vector<8x128xf32> to vector<8x96xf32>
    %111 = arith.negf %110 : vector<8x96xf32>
    %112 = math.exp %111 : vector<8x96xf32>
    %cst_41 = arith.constant 1.000000e+00 : f32
    %113 = vector.broadcast %cst_41 : f32 to vector<8x96xf32>
    %114 = arith.addf %113, %112 : vector<8x96xf32>
    %115 = arith.divf %113, %114 : vector<8x96xf32>
    %116 = vector.extract_strided_slice %109 {offsets = [0, 96], sizes = [8, 32], strides = [1, 1]} : vector<8x128xf32> to vector<8x32xf32>
    %117 = math.tanh %116 : vector<8x32xf32>
    %118 = vector.extract_strided_slice %115 {offsets = [0, 0], sizes = [8, 32], strides = [1, 1]} : vector<8x96xf32> to vector<8x32xf32>
    %119 = vector.extract_strided_slice %115 {offsets = [0, 32], sizes = [8, 32], strides = [1, 1]} : vector<8x96xf32> to vector<8x32xf32>
    %120 = vector.extract_strided_slice %115 {offsets = [0, 64], sizes = [8, 32], strides = [1, 1]} : vector<8x96xf32> to vector<8x32xf32>
    %121 = arith.mulf %119, %100 : vector<8x32xf32>
    %122 = arith.mulf %118, %117 : vector<8x32xf32>
    %123 = arith.addf %121, %122 : vector<8x32xf32>
    %124 = math.tanh %123 : vector<8x32xf32>
    %125 = arith.mulf %120, %124 : vector<8x32xf32>
    %c5_i32 = arith.constant 5 : i32
    %c8_i32_42 = arith.constant 8 : i32
    %126 = arith.muli %c5_i32, %c8_i32_42 : i32
    %127 = tpu.assume_multiple %126, 8 : i32
    %128 = arith.index_cast %127 : i32 to index
    %c0_43 = arith.constant 0 : index
    %129 = vector.load %arg12[%128, %c0_43] : memref<64x128xf32, #tpu.memory_space<vmem>>, vector<8x128xf32>
    %c0_44 = arith.constant 0 : index
    %c0_45 = arith.constant 0 : index
    %130 = vector.load %arg5[%c0_44, %c0_45] : memref<32x128xf32, #tpu.memory_space<vmem>>, vector<32x128xf32>
    %cst_46 = arith.constant dense<0.000000e+00> : vector<8x128xf32>
    %131 = tpu.matmul %125, %130, %cst_46 {dimension_numbers = #tpu.dot_dimension_numbers<[1], [0], [0], [1], [0, 0, 1, 1], [], []>} : vector<8x32xf32>, vector<32x128xf32>, vector<8x128xf32> -> vector<8x128xf32>
    %132 = arith.addf %129, %131 : vector<8x128xf32>
    %133 = vector.extract_strided_slice %132 {offsets = [0, 0], sizes = [8, 96], strides = [1, 1]} : vector<8x128xf32> to vector<8x96xf32>
    %134 = arith.negf %133 : vector<8x96xf32>
    %135 = math.exp %134 : vector<8x96xf32>
    %cst_47 = arith.constant 1.000000e+00 : f32
    %136 = vector.broadcast %cst_47 : f32 to vector<8x96xf32>
    %137 = arith.addf %136, %135 : vector<8x96xf32>
    %138 = arith.divf %136, %137 : vector<8x96xf32>
    %139 = vector.extract_strided_slice %132 {offsets = [0, 96], sizes = [8, 32], strides = [1, 1]} : vector<8x128xf32> to vector<8x32xf32>
    %140 = math.tanh %139 : vector<8x32xf32>
    %141 = vector.extract_strided_slice %138 {offsets = [0, 0], sizes = [8, 32], strides = [1, 1]} : vector<8x96xf32> to vector<8x32xf32>
    %142 = vector.extract_strided_slice %138 {offsets = [0, 32], sizes = [8, 32], strides = [1, 1]} : vector<8x96xf32> to vector<8x32xf32>
    %143 = vector.extract_strided_slice %138 {offsets = [0, 64], sizes = [8, 32], strides = [1, 1]} : vector<8x96xf32> to vector<8x32xf32>
    %144 = arith.mulf %142, %123 : vector<8x32xf32>
    %145 = arith.mulf %141, %140 : vector<8x32xf32>
    %146 = arith.addf %144, %145 : vector<8x32xf32>
    %147 = math.tanh %146 : vector<8x32xf32>
    %148 = arith.mulf %143, %147 : vector<8x32xf32>
    %c6_i32 = arith.constant 6 : i32
    %c8_i32_48 = arith.constant 8 : i32
    %149 = arith.muli %c6_i32, %c8_i32_48 : i32
    %150 = tpu.assume_multiple %149, 8 : i32
    %151 = arith.index_cast %150 : i32 to index
    %c0_49 = arith.constant 0 : index
    %152 = vector.load %arg12[%151, %c0_49] : memref<64x128xf32, #tpu.memory_space<vmem>>, vector<8x128xf32>
    %c0_50 = arith.constant 0 : index
    %c0_51 = arith.constant 0 : index
    %153 = vector.load %arg5[%c0_50, %c0_51] : memref<32x128xf32, #tpu.memory_space<vmem>>, vector<32x128xf32>
    %cst_52 = arith.constant dense<0.000000e+00> : vector<8x128xf32>
    %154 = tpu.matmul %148, %153, %cst_52 {dimension_numbers = #tpu.dot_dimension_numbers<[1], [0], [0], [1], [0, 0, 1, 1], [], []>} : vector<8x32xf32>, vector<32x128xf32>, vector<8x128xf32> -> vector<8x128xf32>
    %155 = arith.addf %152, %154 : vector<8x128xf32>
    %156 = vector.extract_strided_slice %155 {offsets = [0, 0], sizes = [8, 96], strides = [1, 1]} : vector<8x128xf32> to vector<8x96xf32>
    %157 = arith.negf %156 : vector<8x96xf32>
    %158 = math.exp %157 : vector<8x96xf32>
    %cst_53 = arith.constant 1.000000e+00 : f32
    %159 = vector.broadcast %cst_53 : f32 to vector<8x96xf32>
    %160 = arith.addf %159, %158 : vector<8x96xf32>
    %161 = arith.divf %159, %160 : vector<8x96xf32>
    %162 = vector.extract_strided_slice %155 {offsets = [0, 96], sizes = [8, 32], strides = [1, 1]} : vector<8x128xf32> to vector<8x32xf32>
    %163 = math.tanh %162 : vector<8x32xf32>
    %164 = vector.extract_strided_slice %161 {offsets = [0, 0], sizes = [8, 32], strides = [1, 1]} : vector<8x96xf32> to vector<8x32xf32>
    %165 = vector.extract_strided_slice %161 {offsets = [0, 32], sizes = [8, 32], strides = [1, 1]} : vector<8x96xf32> to vector<8x32xf32>
    %166 = vector.extract_strided_slice %161 {offsets = [0, 64], sizes = [8, 32], strides = [1, 1]} : vector<8x96xf32> to vector<8x32xf32>
    %167 = arith.mulf %165, %146 : vector<8x32xf32>
    %168 = arith.mulf %164, %163 : vector<8x32xf32>
    %169 = arith.addf %167, %168 : vector<8x32xf32>
    %170 = math.tanh %169 : vector<8x32xf32>
    %171 = arith.mulf %166, %170 : vector<8x32xf32>
    %c7_i32 = arith.constant 7 : i32
    %c8_i32_54 = arith.constant 8 : i32
    %172 = arith.muli %c7_i32, %c8_i32_54 : i32
    %173 = tpu.assume_multiple %172, 8 : i32
    %174 = arith.index_cast %173 : i32 to index
    %c0_55 = arith.constant 0 : index
    %175 = vector.load %arg12[%174, %c0_55] : memref<64x128xf32, #tpu.memory_space<vmem>>, vector<8x128xf32>
    %c0_56 = arith.constant 0 : index
    %c0_57 = arith.constant 0 : index
    %176 = vector.load %arg5[%c0_56, %c0_57] : memref<32x128xf32, #tpu.memory_space<vmem>>, vector<32x128xf32>
    %cst_58 = arith.constant dense<0.000000e+00> : vector<8x128xf32>
    %177 = tpu.matmul %171, %176, %cst_58 {dimension_numbers = #tpu.dot_dimension_numbers<[1], [0], [0], [1], [0, 0, 1, 1], [], []>} : vector<8x32xf32>, vector<32x128xf32>, vector<8x128xf32> -> vector<8x128xf32>
    %178 = arith.addf %175, %177 : vector<8x128xf32>
    %179 = vector.extract_strided_slice %178 {offsets = [0, 0], sizes = [8, 96], strides = [1, 1]} : vector<8x128xf32> to vector<8x96xf32>
    %180 = arith.negf %179 : vector<8x96xf32>
    %181 = math.exp %180 : vector<8x96xf32>
    %cst_59 = arith.constant 1.000000e+00 : f32
    %182 = vector.broadcast %cst_59 : f32 to vector<8x96xf32>
    %183 = arith.addf %182, %181 : vector<8x96xf32>
    %184 = arith.divf %182, %183 : vector<8x96xf32>
    %185 = vector.extract_strided_slice %178 {offsets = [0, 96], sizes = [8, 32], strides = [1, 1]} : vector<8x128xf32> to vector<8x32xf32>
    %186 = math.tanh %185 : vector<8x32xf32>
    %187 = vector.extract_strided_slice %184 {offsets = [0, 0], sizes = [8, 32], strides = [1, 1]} : vector<8x96xf32> to vector<8x32xf32>
    %188 = vector.extract_strided_slice %184 {offsets = [0, 32], sizes = [8, 32], strides = [1, 1]} : vector<8x96xf32> to vector<8x32xf32>
    %189 = vector.extract_strided_slice %184 {offsets = [0, 64], sizes = [8, 32], strides = [1, 1]} : vector<8x96xf32> to vector<8x32xf32>
    %190 = arith.mulf %188, %169 : vector<8x32xf32>
    %191 = arith.mulf %187, %186 : vector<8x32xf32>
    %192 = arith.addf %190, %191 : vector<8x32xf32>
    %193 = math.tanh %192 : vector<8x32xf32>
    %194 = arith.mulf %189, %193 : vector<8x32xf32>
    %c8_i32_60 = arith.constant 8 : i32
    %c56 = arith.constant 56 : index
    %c0_61 = arith.constant 0 : index
    %195 = vector.load %arg0[%c56, %c0_61] : memref<64x16xf32, #tpu.memory_space<vmem>>, vector<8x16xf32>
    %c0_62 = arith.constant 0 : index
    %c0_63 = arith.constant 0 : index
    %196 = vector.load %arg4[%c0_62, %c0_63] : memref<16x128xf32, #tpu.memory_space<vmem>>, vector<16x128xf32>
    %cst_64 = arith.constant dense<0.000000e+00> : vector<8x128xf32>
    %197 = tpu.matmul %195, %196, %cst_64 {dimension_numbers = #tpu.dot_dimension_numbers<[1], [0], [0], [1], [0, 0, 1, 1], [], []>} : vector<8x16xf32>, vector<16x128xf32>, vector<8x128xf32> -> vector<8x128xf32>
    %c1 = arith.constant 1 : index
    %c0_65 = arith.constant 0 : index
    %c0_66 = arith.constant 0 : index
    %198 = vector.load %arg1[%c1, %c0_65, %c0_66] : memref<2x8x32xf32, #tpu.memory_space<vmem>>, vector<1x8x32xf32>
    %199 = vector.shape_cast %198 : vector<1x8x32xf32> to vector<8x32xf32>
    %c0_67 = arith.constant 0 : index
    %c0_68 = arith.constant 0 : index
    %200 = vector.load %arg6[%c0_67, %c0_68] : memref<32x128xf32, #tpu.memory_space<vmem>>, vector<32x128xf32>
    %cst_69 = arith.constant dense<0.000000e+00> : vector<8x128xf32>
    %201 = tpu.matmul %199, %200, %cst_69 {dimension_numbers = #tpu.dot_dimension_numbers<[1], [0], [0], [1], [0, 0, 1, 1], [], []>} : vector<8x32xf32>, vector<32x128xf32>, vector<8x128xf32> -> vector<8x128xf32>
    %202 = arith.addf %197, %201 : vector<8x128xf32>
    %c0_70 = arith.constant 0 : index
    %c0_71 = arith.constant 0 : index
    %203 = vector.load %arg8[%c0_70, %c0_71] : memref<1x128xf32, #tpu.memory_space<vmem>>, vector<1x128xf32>
    %204 = vector.broadcast %203 : vector<1x128xf32> to vector<8x128xf32>
    %205 = arith.addf %202, %204 : vector<8x128xf32>
    %c1_72 = arith.constant 1 : index
    %c0_73 = arith.constant 0 : index
    %c0_74 = arith.constant 0 : index
    %206 = vector.load %arg2[%c1_72, %c0_73, %c0_74] : memref<2x8x32xf32, #tpu.memory_space<vmem>>, vector<1x8x32xf32>
    %207 = vector.shape_cast %206 : vector<1x8x32xf32> to vector<8x32xf32>
    %208 = vector.extract_strided_slice %205 {offsets = [0, 0], sizes = [8, 96], strides = [1, 1]} : vector<8x128xf32> to vector<8x96xf32>
    %209 = arith.negf %208 : vector<8x96xf32>
    %210 = math.exp %209 : vector<8x96xf32>
    %cst_75 = arith.constant 1.000000e+00 : f32
    %211 = vector.broadcast %cst_75 : f32 to vector<8x96xf32>
    %212 = arith.addf %211, %210 : vector<8x96xf32>
    %213 = arith.divf %211, %212 : vector<8x96xf32>
    %214 = vector.extract_strided_slice %205 {offsets = [0, 96], sizes = [8, 32], strides = [1, 1]} : vector<8x128xf32> to vector<8x32xf32>
    %215 = math.tanh %214 : vector<8x32xf32>
    %216 = vector.extract_strided_slice %213 {offsets = [0, 0], sizes = [8, 32], strides = [1, 1]} : vector<8x96xf32> to vector<8x32xf32>
    %217 = vector.extract_strided_slice %213 {offsets = [0, 32], sizes = [8, 32], strides = [1, 1]} : vector<8x96xf32> to vector<8x32xf32>
    %218 = vector.extract_strided_slice %213 {offsets = [0, 64], sizes = [8, 32], strides = [1, 1]} : vector<8x96xf32> to vector<8x32xf32>
    %219 = arith.mulf %217, %207 : vector<8x32xf32>
    %220 = arith.mulf %216, %215 : vector<8x32xf32>
    %221 = arith.addf %219, %220 : vector<8x32xf32>
    %222 = math.tanh %221 : vector<8x32xf32>
    %223 = arith.mulf %218, %222 : vector<8x32xf32>
    %c0_76 = arith.constant 0 : index
    %c0_77 = arith.constant 0 : index
    %224 = vector.load %arg9[%c0_76, %c0_77] : memref<64x16xf32, #tpu.memory_space<vmem>>, vector<32x16xf32>
    %cst_78 = arith.constant dense<0.000000e+00> : vector<8x16xf32>
    %225 = tpu.matmul %194, %224, %cst_78 {dimension_numbers = #tpu.dot_dimension_numbers<[1], [0], [0], [1], [0, 0, 1, 1], [], []>} : vector<8x32xf32>, vector<32x16xf32>, vector<8x16xf32> -> vector<8x16xf32>
    %c32 = arith.constant 32 : index
    %c0_79 = arith.constant 0 : index
    %226 = vector.load %arg9[%c32, %c0_79] : memref<64x16xf32, #tpu.memory_space<vmem>>, vector<32x16xf32>
    %cst_80 = arith.constant dense<0.000000e+00> : vector<8x16xf32>
    %227 = tpu.matmul %223, %226, %cst_80 {dimension_numbers = #tpu.dot_dimension_numbers<[1], [0], [0], [1], [0, 0, 1, 1], [], []>} : vector<8x32xf32>, vector<32x16xf32>, vector<8x16xf32> -> vector<8x16xf32>
    %228 = arith.addf %225, %227 : vector<8x16xf32>
    %c0_81 = arith.constant 0 : index
    %c0_82 = arith.constant 0 : index
    %229 = vector.load %arg10[%c0_81, %c0_82] : memref<1x16xf32, #tpu.memory_space<vmem>>, vector<1x16xf32>
    %230 = vector.broadcast %229 : vector<1x16xf32> to vector<8x16xf32>
    %231 = arith.addf %228, %230 : vector<8x16xf32>
    %c0_83 = arith.constant 0 : index
    %c0_84 = arith.constant 0 : index
    %232 = vector.load %arg11[%c0_83, %c0_84] : memref<8x16xf32, #tpu.memory_space<vmem>>, vector<8x16xf32>
    tpu.vector_store %arg11[%c0_83, %c0_84], %231 {strides = array<i32>} : memref<8x16xf32, #tpu.memory_space<vmem>>, vector<8x16xf32>,
    return
  }
}

</mosaic_0001>

<bundles_post_ra>
// kernel: tpu_custom_call.1
= control target key start
LH: loop header
LB: loop body
LE: loop exit
PB: predicated region body
PF: predicated region fallthrough
CT: control target
= control target key end

     0   :  { %vm56_vm0 = vcmask 130048   ;;  %v1813_v3 = vmov 0.0|0.0   ;;  %vm1814_vm1 = vmmov 0   ;;  %v1815_v10 = vmov 0.0   ;;  %s2152_s0 = inlined_call_operand.vmem [shape: f32[64,16], index: 0, kind: input, shape index: {}]   ;;  %s2153_s1 = inlined_call_operand.vmem [shape: f32[2,8,32], index: 1, kind: input, shape index: {}]   ;;  %s2154_s2 = inlined_call_operand.vmem [shape: f32[2,8,32], index: 2, kind: input, shape index: {}]   ;;  %s2155_s3 = inlined_call_operand.vmem [shape: f32[16,128], index: 3, kind: input, shape index: {}]   ;;  %s2156_s4 = inlined_call_operand.vmem [shape: f32[16,128], index: 4, kind: input, shape index: {}]   ;;  %s2157_s5 = inlined_call_operand.vmem [shape: f32[32,128], index: 5, kind: input, shape index: {}]   ;;  %s2158_s6 = inlined_call_operand.vmem [shape: f32[32,128], index: 6, kind: input, shape index: {}]   ;;  %s2159_s7 = inlined_call_operand.vmem [shape: f32[1,128], index: 7, kind: input, shape index: {}]   ;;  %s2160_s8 = inlined_call_operand.vmem [shape: f32[1,128], index: 8, kind: input, shape index: {}]   ;;  %s2161_s9 = inlined_call_operand.vmem [shape: f32[64,16], index: 9, kind: input, shape index: {}]   ;;  %s2162_s10 = inlined_call_operand.vmem [shape: f32[1,16], index: 10, kind: input, shape index: {}]   ;;  %s2163_s11 = inlined_call_operand.hbm [shape: f32[8,16], index: 11, kind: output, shape index: {}]  }
   0x1   :  { %v47_v0 = vld [vmem:[%s2155_s3] sm:$0xff]  ;;  %v48_v1 = vld [vmem:[%s2155_s3 + $0x8] sm:$0xff]  ;;  %1642 = vmatprep.subr.bf16.mxu1 %v1813_v3  ;;  %v199_v8 = vld [vmem:[%s2157_s5 + $0x10] sm:$0xff]  ;;  %1518 = vmatprep.mubr.msk.f32.mxu1 %vm1814_vm1, %v1815_v10 }
   0x2   :  { %v197_v2 = vld [vmem:[%s2157_s5] sm:$0xff]  ;;  %v1638_v4 = vpack.c.bf16 %v48_v1, %v47_v0  ;;  %v198_v5 = vld [vmem:[%s2157_s5 + $0x8] sm:$0xff]  ;;  %v200_v9 = vld [vmem:[%s2157_s5 + $0x18] sm:$0xff] }
   0x3   :  { %v39_v6 = vld [vmem:[%s2152_s0] sm:$0xff]  ;;  %v1895_v7 = vpack.c.bf16 %v198_v5, %v197_v2 }
   0x4   :  { %1498 = vmatprep.mubr.msk.f32.mxu0 %vm56_vm0, %v39_v6  ;;  %1639 = vmatprep.subr.bf16.mxu0 %v1638_v4 }
   0x5   :  { %16 = vsyncpa [#allocation4], 0  ;;  %1644 = vmatpush3.bf16.msra.mxu1 %v1895_v7  ;;  %1641 = vmatpush3.bf16.msra.mxu0 %v1638_v4  ;;  %v40_v11 = vld [vmem:[%s2152_s0 + $0x8] sm:$0xff]  ;;  %v1910_v12 = vpack.c.bf16 %v200_v9, %v199_v8  ;;  %v194_v13 = vld [vmem:[%s2153_s1] sm:$0xff]  ;;  %vm201_vm2 = vcmask 261120   ;;  %s1816_s16 = smov 32  }
   0x6   :  { %1645 = vmatprep.subr.bf16.mxu1 %v1813_v3  ;;  %1654 = vmatprep.subr.bf16.mxu0 %v1813_v3  ;;  %v1934_v14 = vld [vmem:[%s2159_s7] ss:$0 sm:$0xff]  ;;  %s1817_s7 = smov 64   ;;  %v41_v51 = vld [vmem:[%s2152_s0 + $0x10] sm:$0xff]  ;;  %v42_v52 = vld [vmem:[%s2152_s0 + $0x18] sm:$0xff]  ;;  %s1818_s18 = smov [#allocation3]  }
   0x7   :  { %v195_v22 = vld [vmem:[%s2154_s2] sm:$0xff]  ;;  %v44_v54 = vld [vmem:[%s2152_s0 + $0x28] sm:$0xff]  ;;  %v45_v55 = vld [vmem:[%s2152_s0 + $0x30] sm:$0xff]  ;;  %s1384_s19 = sshll.u32 %s1818_s18, 4  ;;  %s1385_s19 = int_to_ptr.vmem [resolvable:$true] %s1384_s19 }
   0x8   :  { %1499 = vmatmul.mubr.msk.f32.vlgmr.msra.gmra.mrb[0].mxu0 %vm56_vm0, %v40_v11  ;;  %v43_v53 = vld [vmem:[%s2152_s0 + $0x20] sm:$0xff]  ;;  %v1978_v56 = vld [vmem:[%s2152_s0 + $0x38] sm:$0xff]  ;;  %p1794_p1 = scmp.lt.s32.totalorder %s1385_s19, %s1385_s19 }
   0x9   :  { %1647 = vmatpush3.bf16.msra.mxu1 %v1910_v12  ;;  %1656 = vmatpush3.bf16.msra.mxu0 %v1895_v7 }
   0xa   :  { %1648 = vmatprep.subr.bf16.mxu1 %v1813_v3  ;;  %1657 = vmatprep.subr.bf16.mxu0 %v1813_v3 }
   0xb   :  { %1501 = vmatprep.mubr.msk.f32.mxu0 %vm56_vm0, %v41_v51 }
   0xc   :  { %1519 = vmatmul.mubr.msk.f32.vlgmr.msra.gmra.mrb[0].mxu1 %vm201_vm2, %v194_v13  ;;  %1502 = vmatmul.mubr.msk.f32.gmra.mrb[2].mxu0 %vm56_vm0, %v42_v52 }
   0xd   :  { %1650 = vmatpush3.bf16.msra.mxu1 %v1895_v7  ;;  %1529 = vmatprep.mubr.msk.f32.mxu1 %vm1814_vm1, %v1815_v10 }
   0xe   :  { %1651 = vmatprep.subr.bf16.mxu1 %v1813_v3  ;;  %1659 = vmatpush3.bf16.msra.mxu0 %v1910_v12 }
   0xf   :  { %1666 = vmatprep.subr.bf16.mxu0 %v1813_v3  ;;  %1504 = vmatprep.mubr.msk.f32.mxu0 %vm56_vm0, %v43_v53 }
  0x10   :  { %1505 = vmatmul.mubr.msk.f32.gmra.mrb[4].mxu0 %vm56_vm0, %v44_v54 }
  0x11   :  { %1653 = vmatpush3.bf16.msra.mxu1 %v1910_v12  ;;  %1507 = vmatprep.mubr.msk.f32.mxu0 %vm56_vm0, %v45_v55 }
  0x12   :  { %1660 = vmatprep.subr.bf16.mxu1 %v1813_v3 }
  0x14   :  { %1508 = vmatmul.mubr.msk.f32.gmra.mrb[6].mxu0 %vm56_vm0, %v1978_v56 }
  0x15   :  { %1540 = vmatprep.mubr.msk.f32.mxu0 %vm1814_vm1, %v1815_v10 }
  0xdb   :  { %v1500_v15 = vpop.f32.mrb[0].mxu0 }
  0xdc   :  { %v147_v16 = vpop.f32.mrb[1].mxu0  ;;  %v153_v37 = vadd.f32 %v1500_v15, %v1934_v14 }
  0xdd   :  { %v148_v17 = vadd.f32 %v1934_v14, %v147_v16 }
  0xdf   :  { %v271_v18 = vpop.f32.mrb[0].mxu1  ;;  %v1503_v60 = vpop.f32.mrb[2].mxu0 }
  0xe0   :  { %v275_v19 = vadd.f32 %v271_v18, %v148_v17  ;;  %v1520_v20 = vpop.f32.mrb[1].mxu1  ;;  %v157_v61 = vpop.f32.mrb[3].mxu0 }
  0xe1   :  { %v158_v4 = vadd.f32 %v1934_v14, %v157_v61 }
  0xe2   :  { %1717 = vtanh.f32 %v275_v19  ;;  %v1402_v23 = vmul.f32 -1.442695, %v275_v19 }
  0xe3   :  { %v1986_v62 = vpop.f32.mrb[4].mxu0 }
  0xe4   :  { %1719 = vpow2.f32 %v1402_v23  ;;  %v1988_v63 = vpop.f32.mrb[5].mxu0 }
  0xe7   :  { %v1990_v0 = vpop.f32.mrb[6].mxu0 }
  0xe8   :  { %v1992_v1 = vpop.f32.mrb[7].mxu0 }
  0xec   :  { %v1718_v21 = vpop.eup %1717 }
  0xed   :  { %289 = vrot.lane.b32.xlu0 %v1718_v21, %s1816_s16 }
  0xee   :  { %v1720_v24 = vpop.eup %1719 }
  0xef   :  { %v279_v25 = vadd.f32 1.0, %v1720_v24 }
  0xf1   :  { %284 = vrot.lane.b32.xlu0 %v195_v22, %s1816_s16  ;;  %1721 = vrcp.f32 %v279_v25 }
  0xfb   :  { %v1722_v26 = vpop.eup %1721 }
 0x15f   :  { %v290_v27 = vpop.permute.xlu0 %289 }
 0x160   :  { %v292_v28 = vmul.f32 %v1722_v26, %v290_v27 }
 0x162   :  { %294 = vrot.lane.b32.xlu1 %v292_v28, %s1816_s16 }
 0x163   :  { %v285_v29 = vpop.permute.xlu0 %284 }
 0x164   :  { %v287_v30 = vmul.f32 %v1722_v26, %v285_v29 }
 0x1d4   :  { %v295_v31 = vpop.permute.xlu1 %294 }
 0x1d5   :  { %v297_v32 = vadd.f32 %v295_v31, %v287_v30 }
 0x1d7   :  { %1723 = vtanh.f32 %v297_v32 }
 0x1e1   :  { %v1724_v33 = vpop.eup %1723 }
 0x1e2   :  { %300 = vrot.lane.b32.xlu1 %v1724_v33, %s1816_s16 }
 0x254   :  { %v301_v34 = vpop.permute.xlu1 %300 }
 0x255   :  { %v303_v35 = vmul.f32 %v1722_v26, %v301_v34  ;;  %v163_v26 = vadd.f32 %v1503_v60, %v1934_v14 }
 0x257   :  { %307 = vrot.lane.b32.xlu0 %v303_v35, %s1817_s7 }
 0x2c9   :  { %v308_v36 = vpop.permute.xlu0 %307 }
 0x2ca   :  { %1530 = vmatmul.mubr.msk.f32.vlgmr.msra.gmra.mrb[2].mxu1 %vm201_vm2, %v308_v36 }
 0x2cb   :  { %1662 = vmatpush3.bf16.msra.mxu1 %v1895_v7  ;;  %1551 = vmatprep.mubr.msk.f32.mxu1 %vm1814_vm1, %v1815_v10 }
 0x2cc   :  { %1663 = vmatprep.subr.bf16.mxu1 %v1813_v3 }
 0x2cf   :  { %1665 = vmatpush3.bf16.msra.mxu1 %v1910_v12 }
 0x2d0   :  { %1672 = vmatprep.subr.bf16.mxu1 %v1813_v3 }
 0x39d   :  { %v377_v38 = vpop.f32.mrb[2].mxu1 }
 0x39e   :  { %v381_v39 = vadd.f32 %v377_v38, %v153_v37  ;;  %v1531_v40 = vpop.f32.mrb[3].mxu1 }
 0x3a0   :  { %1725 = vtanh.f32 %v381_v39  ;;  %v1404_v42 = vmul.f32 -1.442695, %v381_v39 }
 0x3a2   :  { %1727 = vpow2.f32 %v1404_v42 }
 0x3aa   :  { %v1726_v41 = vpop.eup %1725 }
 0x3ab   :  { %391 = vrot.lane.b32.xlu1 %v1726_v41, %s1816_s16 }
 0x3ac   :  { %v1728_v43 = vpop.eup %1727 }
 0x3ad   :  { %v385_v44 = vadd.f32 1.0, %v1728_v43 }
 0x3af   :  { %1729 = vrcp.f32 %v385_v44  ;;  %v168_v44 = vadd.f32 %v1934_v14, %v1988_v63 }
 0x3b9   :  { %v1730_v45 = vpop.eup %1729 }
 0x3ba   :  { %v389_v48 = vmul.f32 %v1730_v45, %v297_v32 }
 0x41d   :  { %v392_v46 = vpop.permute.xlu1 %391 }
 0x41e   :  { %v394_v47 = vmul.f32 %v1730_v45, %v392_v46 }
 0x420   :  { %396 = vrot.lane.b32.xlu0 %v394_v47, %s1816_s16 }
 0x492   :  { %v397_v49 = vpop.permute.xlu0 %396 }
 0x493   :  { %v399_v50 = vadd.f32 %v397_v49, %v389_v48 }
 0x495   :  { %1731 = vtanh.f32 %v399_v50 }
 0x49f   :  { %v1732_v57 = vpop.eup %1731 }
 0x4a0   :  { %402 = vrot.lane.b32.xlu1 %v1732_v57, %s1816_s16 }
 0x512   :  { %v403_v58 = vpop.permute.xlu1 %402 }
 0x513   :  { %v405_v59 = vmul.f32 %v1730_v45, %v403_v58 }
 0x515   :  { %409 = vrot.lane.b32.xlu0 %v405_v59, %s1817_s7 }
 0x587   :  { %v410_v2 = vpop.permute.xlu0 %409 }
 0x588   :  { %1541 = vmatmul.mubr.msk.f32.vlgmr.msra.gmra.mrb[8].mxu0 %vm201_vm2, %v410_v2  ;;  %v173_v2 = vadd.f32 %v1986_v62, %v1934_v14 }
 0x589   :  { %1668 = vmatpush3.bf16.msra.mxu0 %v1895_v7  ;;  %1562 = vmatprep.mubr.msk.f32.mxu0 %vm1814_vm1, %v1815_v10 }
 0x58a   :  { %1669 = vmatprep.subr.bf16.mxu0 %v1813_v3 }
 0x58d   :  { %1671 = vmatpush3.bf16.msra.mxu0 %v1910_v12 }
 0x58e   :  { %1678 = vmatprep.subr.bf16.mxu0 %v1813_v3 }
 0x65b   :  { %v479_v5 = vpop.f32.mrb[8].mxu0 }
 0x65c   :  { %v483_v6 = vadd.f32 %v479_v5, %v158_v4  ;;  %v1542_v8 = vpop.f32.mrb[9].mxu0 }
 0x65e   :  { %1733 = vtanh.f32 %v483_v6  ;;  %v1406_v11 = vmul.f32 -1.442695, %v483_v6 }
 0x660   :  { %1735 = vpow2.f32 %v1406_v11 }
 0x668   :  { %v1734_v9 = vpop.eup %1733 }
 0x669   :  { %493 = vrot.lane.b32.xlu1 %v1734_v9, %s1816_s16 }
 0x66a   :  { %v1736_v13 = vpop.eup %1735 }
 0x66b   :  { %v487_v15 = vadd.f32 1.0, %v1736_v13 }
 0x66d   :  { %1737 = vrcp.f32 %v487_v15 }
 0x677   :  { %v1738_v16 = vpop.eup %1737 }
 0x678   :  { %v491_v19 = vmul.f32 %v1738_v16, %v399_v50 }
 0x6db   :  { %v494_v17 = vpop.permute.xlu1 %493 }
 0x6dc   :  { %v496_v18 = vmul.f32 %v1738_v16, %v494_v17 }
 0x6de   :  { %498 = vrot.lane.b32.xlu0 %v496_v18, %s1816_s16 }
 0x750   :  { %v499_v20 = vpop.permute.xlu0 %498 }
 0x751   :  { %v501_v21 = vadd.f32 %v499_v20, %v491_v19 }
 0x753   :  { %1739 = vtanh.f32 %v501_v21 }
 0x75d   :  { %v1740_v22 = vpop.eup %1739 }
 0x75e   :  { %504 = vrot.lane.b32.xlu1 %v1740_v22, %s1816_s16  ;;  %v178_v22 = vadd.f32 %v1934_v14, %v1992_v1 }
 0x7d0   :  { %v505_v23 = vpop.permute.xlu1 %504 }
 0x7d1   :  { %v507_v24 = vmul.f32 %v1738_v16, %v505_v23 }
 0x7d3   :  { %511 = vrot.lane.b32.xlu0 %v507_v24, %s1817_s7 }
 0x845   :  { %v512_v25 = vpop.permute.xlu0 %511 }
 0x846   :  { %1552 = vmatmul.mubr.msk.f32.vlgmr.msra.gmra.mrb[4].mxu1 %vm201_vm2, %v512_v25 }
 0x847   :  { %1674 = vmatpush3.bf16.msra.mxu1 %v1895_v7  ;;  %1573 = vmatprep.mubr.msk.f32.mxu1 %vm1814_vm1, %v1815_v10 }
 0x848   :  { %1675 = vmatprep.subr.bf16.mxu1 %v1813_v3 }
 0x84b   :  { %1677 = vmatpush3.bf16.msra.mxu1 %v1910_v12 }
 0x84c   :  { %1684 = vmatprep.subr.bf16.mxu1 %v1813_v3 }
 0x919   :  { %v581_v27 = vpop.f32.mrb[4].mxu1 }
 0x91a   :  { %v585_v28 = vadd.f32 %v581_v27, %v163_v26  ;;  %v1553_v29 = vpop.f32.mrb[5].mxu1 }
 0x91c   :  { %1741 = vtanh.f32 %v585_v28  ;;  %v1408_v31 = vmul.f32 -1.442695, %v585_v28 }
 0x91e   :  { %1743 = vpow2.f32 %v1408_v31 }
 0x926   :  { %v1742_v30 = vpop.eup %1741 }
 0x927   :  { %595 = vrot.lane.b32.xlu1 %v1742_v30, %s1816_s16 }
 0x928   :  { %v1744_v32 = vpop.eup %1743 }
 0x929   :  { %v589_v33 = vadd.f32 1.0, %v1744_v32 }
 0x92b   :  { %1745 = vrcp.f32 %v589_v33 }
 0x935   :  { %v1746_v34 = vpop.eup %1745 }
 0x936   :  { %v593_v37 = vmul.f32 %v1746_v34, %v501_v21 }
 0x999   :  { %v596_v35 = vpop.permute.xlu1 %595 }
 0x99a   :  { %v598_v36 = vmul.f32 %v1746_v34, %v596_v35  ;;  %v1023_v35 = vld [vmem:[%s2158_s6] sm:$0xff] }
 0x99c   :  { %600 = vrot.lane.b32.xlu0 %v598_v36, %s1816_s16  ;;  %v1024_v36 = vld [vmem:[%s2158_s6 + $0x8] sm:$0xff] }
 0xa0e   :  { %v601_v38 = vpop.permute.xlu0 %600 }
 0xa0f   :  { %v603_v39 = vadd.f32 %v601_v38, %v593_v37  ;;  %v1691_v37 = vpack.c.bf16 %v1024_v36, %v1023_v35 }
 0xa11   :  { %1747 = vtanh.f32 %v603_v39 }
 0xa1b   :  { %v1748_v40 = vpop.eup %1747 }
 0xa1c   :  { %606 = vrot.lane.b32.xlu1 %v1748_v40, %s1816_s16  ;;  %v1026_v40 = vld [vmem:[%s2158_s6 + $0x18] sm:$0xff] }
 0xa8e   :  { %v607_v41 = vpop.permute.xlu1 %606 }
 0xa8f   :  { %v609_v42 = vmul.f32 %v1746_v34, %v607_v41 }
 0xa91   :  { %613 = vrot.lane.b32.xlu0 %v609_v42, %s1817_s7  ;;  %v1417_v42 = vld [vmem:[%s2153_s1 + $0x8] sm:$0xff] }
 0xb03   :  { %v614_v43 = vpop.permute.xlu0 %613 }
 0xb04   :  { %1563 = vmatmul.mubr.msk.f32.vlgmr.msra.gmra.mrb[10].mxu0 %vm201_vm2, %v614_v43 }
 0xb05   :  { %1680 = vmatpush3.bf16.msra.mxu0 %v1895_v7  ;;  %1584 = vmatprep.mubr.msk.f32.mxu0 %vm1814_vm1, %v1815_v10 }
 0xb06   :  { %1681 = vmatprep.subr.bf16.mxu0 %v1813_v3 }
 0xb09   :  { %1683 = vmatpush3.bf16.msra.mxu0 %v1910_v12 }
 0xb0a   :  { %1690 = vmatprep.subr.bf16.mxu0 %v1813_v3 }
 0xbd7   :  { %v683_v45 = vpop.f32.mrb[10].mxu0 }
 0xbd8   :  { %v687_v46 = vadd.f32 %v683_v45, %v168_v44  ;;  %v1564_v47 = vpop.f32.mrb[11].mxu0  ;;  %v1019_v45 = vld [vmem:[%s2156_s4] sm:$0xff] }
 0xbda   :  { %1749 = vtanh.f32 %v687_v46  ;;  %v1410_v49 = vmul.f32 -1.442695, %v687_v46  ;;  %v1020_v46 = vld [vmem:[%s2156_s4 + $0x8] sm:$0xff] }
 0xbdb   :  { %v1697_v47 = vpack.c.bf16 %v1020_v46, %v1019_v45 }
 0xbdc   :  { %1751 = vpow2.f32 %v1410_v49 }
 0xbe4   :  { %v1750_v48 = vpop.eup %1749 }
 0xbe5   :  { %697 = vrot.lane.b32.xlu1 %v1750_v48, %s1816_s16 }
 0xbe6   :  { %v1752_v50 = vpop.eup %1751 }
 0xbe7   :  { %v691_v51 = vadd.f32 1.0, %v1752_v50 }
 0xbe9   :  { %1753 = vrcp.f32 %v691_v51  ;;  %v183_v51 = vadd.f32 %v1990_v0, %v1934_v14 }
 0xbf3   :  { %v1754_v52 = vpop.eup %1753 }
 0xbf4   :  { %v695_v55 = vmul.f32 %v1754_v52, %v603_v39  ;;  %v1025_v39 = vld [vmem:[%s2158_s6 + $0x10] sm:$0xff] }
 0xbf5   :  { %v1694_v41 = vpack.c.bf16 %v1026_v40, %v1025_v39 }
 0xc57   :  { %v698_v53 = vpop.permute.xlu1 %697 }
 0xc58   :  { %v700_v54 = vmul.f32 %v1754_v52, %v698_v53 }
 0xc5a   :  { %702 = vrot.lane.b32.xlu0 %v700_v54, %s1816_s16 }
 0xccc   :  { %v703_v57 = vpop.permute.xlu0 %702 }
 0xccd   :  { %v705_v58 = vadd.f32 %v703_v57, %v695_v55  ;;  %v1420_v57 = vld [vmem:[%s2160_s8] ss:$0 sm:$0xff] }
 0xccf   :  { %1755 = vtanh.f32 %v705_v58 }
 0xcd9   :  { %v1756_v59 = vpop.eup %1755 }
 0xcda   :  { %708 = vrot.lane.b32.xlu1 %v1756_v59, %s1816_s16 }
 0xd4c   :  { %v709_v60 = vpop.permute.xlu1 %708 }
 0xd4d   :  { %v711_v61 = vmul.f32 %v1754_v52, %v709_v60 }
 0xd4f   :  { %715 = vrot.lane.b32.xlu0 %v711_v61, %s1817_s7 }
 0xdc1   :  { %v716_v63 = vpop.permute.xlu0 %715 }
 0xdc2   :  { %1574 = vmatmul.mubr.msk.f32.vlgmr.msra.gmra.mrb[6].mxu1 %vm201_vm2, %v716_v63 }
 0xdc3   :  { %1686 = vmatpush3.bf16.msra.mxu1 %v1895_v7  ;;  %1595 = vmatprep.mubr.msk.f32.mxu1 %vm1814_vm1, %v1815_v10 }
 0xdc4   :  { %1687 = vmatprep.subr.bf16.mxu1 %v1813_v3 }
 0xdc7   :  { %1689 = vmatpush3.bf16.msra.mxu1 %v1910_v12 }
 0xdc8   :  { %1696 = vmatprep.subr.bf16.mxu1 %v1813_v3 }
 0xe95   :  { %v785_v4 = vpop.f32.mrb[6].mxu1 }
 0xe96   :  { %v789_v5 = vadd.f32 %v785_v4, %v173_v2  ;;  %v1575_v6 = vpop.f32.mrb[7].mxu1 }
 0xe98   :  { %1757 = vtanh.f32 %v789_v5  ;;  %v1412_v7 = vmul.f32 -1.442695, %v789_v5 }
 0xe9a   :  { %1759 = vpow2.f32 %v1412_v7 }
 0xea2   :  { %v1758_v8 = vpop.eup %1757 }
 0xea3   :  { %799 = vrot.lane.b32.xlu1 %v1758_v8, %s1816_s16 }
 0xea4   :  { %v1760_v9 = vpop.eup %1759 }
 0xea5   :  { %v793_v11 = vadd.f32 1.0, %v1760_v9 }
 0xea7   :  { %1761 = vrcp.f32 %v793_v11 }
 0xeb1   :  { %v1762_v13 = vpop.eup %1761 }
 0xeb2   :  { %v797_v16 = vmul.f32 %v1762_v13, %v705_v58 }
 0xf15   :  { %v800_v15 = vpop.permute.xlu1 %799 }
 0xf16   :  { %v802_v12 = vmul.f32 %v1762_v13, %v800_v15 }
 0xf18   :  { %804 = vrot.lane.b32.xlu0 %v802_v12, %s1816_s16 }
 0xf8a   :  { %v805_v17 = vpop.permute.xlu0 %804 }
 0xf8b   :  { %v807_v62 = vadd.f32 %v805_v17, %v797_v16 }
 0xf8d   :  { %1763 = vtanh.f32 %v807_v62 }
 0xf97   :  { %v1764_v18 = vpop.eup %1763 }
 0xf98   :  { %810 = vrot.lane.b32.xlu1 %v1764_v18, %s1816_s16 }
0x100a   :  { %v811_v19 = vpop.permute.xlu1 %810 }
0x100b   :  { %v813_v20 = vmul.f32 %v1762_v13, %v811_v19 }
0x100d   :  { %817 = vrot.lane.b32.xlu0 %v813_v20, %s1817_s7  ;;  %v1211_v20 = vld [vmem:[%s2161_s9] sm:$0xff] }
0x107f   :  { %v818_v21 = vpop.permute.xlu0 %817 }
0x1080   :  { %1585 = vmatmul.mubr.msk.f32.vlgmr.msra.gmra.mrb[12].mxu0 %vm201_vm2, %v818_v21  ;;  %v1212_v21 = vld [vmem:[%s2161_s9 + $0x8] sm:$0xff] }
0x1081   :  { %1606 = vmatprep.mubr.msk.f32.mxu0 %vm1814_vm1, %v1815_v10  ;;  %1692 = vmatpush3.bf16.msra.mxu0 %v1691_v37 }
0x1082   :  { %1693 = vmatprep.subr.bf16.mxu0 %v1813_v3 }
0x1085   :  { %1695 = vmatpush3.bf16.msra.mxu0 %v1694_v41  ;;  %v1425_v41 = vld [vmem:[%s2162_s10] ss:$0 sm:$0xff] }
0x1086   :  { %1699 = vmatprep.subr.bf16.mxu0 %v1813_v3 }
0x1088   :  { %1607 = vmatmul.mubr.msk.f32.vlgmr.msra.gmra.mrb[14].mxu0 %vm201_vm2, %v1417_v42 }
0x1089   :  { %1624 = vmatprep.mubr.msk.f32.mxu0 %vm1814_vm1, %v1815_v10 }
0x1153   :  { %v887_v23 = vpop.f32.mrb[12].mxu0 }
0x1154   :  { %v891_v24 = vadd.f32 %v887_v23, %v178_v22  ;;  %v1586_v25 = vpop.f32.mrb[13].mxu0  ;;  %v1213_v22 = vld [vmem:[%s2161_s9 + $0x10] sm:$0xff]  ;;  %v1706_v23 = vpack.c.bf16 %v1212_v21, %v1211_v20 }
0x1155   :  { %v1215_v25 = vld [vmem:[%s2161_s9 + $0x20] sm:$0xff] }
0x1156   :  { %1765 = vtanh.f32 %v891_v24  ;;  %v1414_v27 = vmul.f32 -1.442695, %v891_v24  ;;  %v1214_v24 = vld [vmem:[%s2161_s9 + $0x18] sm:$0xff] }
0x1158   :  { %1767 = vpow2.f32 %v1414_v27 }
0x115b   :  { %v1096_v49 = vpop.f32.mrb[14].mxu0 }
0x115c   :  { %v1608_v50 = vpop.f32.mrb[15].mxu0 }
0x1160   :  { %v1766_v26 = vpop.eup %1765 }
0x1161   :  { %901 = vrot.lane.b32.xlu1 %v1766_v26, %s1816_s16  ;;  %v1216_v26 = vld [vmem:[%s2161_s9 + $0x28] sm:$0xff] }
0x1162   :  { %v1768_v28 = vpop.eup %1767  ;;  %v1700_v27 = vpack.c.bf16 %v1216_v26, %v1215_v25 }
0x1163   :  { %v895_v29 = vadd.f32 1.0, %v1768_v28  ;;  %v1709_v28 = vpack.c.bf16 %v1214_v24, %v1213_v22 }
0x1164   :  { %1701 = vmatpush3.bf16.msra.mxu0 %v1700_v27 }
0x1165   :  { %1769 = vrcp.f32 %v895_v29  ;;  %1702 = vmatprep.subr.bf16.mxu0 %v1813_v3 }
0x116f   :  { %v1770_v30 = vpop.eup %1769 }
0x1170   :  { %v899_v33 = vmul.f32 %v1770_v30, %v807_v62 }
0x11d3   :  { %v902_v31 = vpop.permute.xlu1 %901 }
0x11d4   :  { %v904_v32 = vmul.f32 %v1770_v30, %v902_v31  ;;  %v1217_v31 = vld [vmem:[%s2161_s9 + $0x30] sm:$0xff] }
0x11d6   :  { %906 = vrot.lane.b32.xlu0 %v904_v32, %s1816_s16  ;;  %v1218_v32 = vld [vmem:[%s2161_s9 + $0x38] sm:$0xff] }
0x1248   :  { %v907_v34 = vpop.permute.xlu0 %906 }
0x1249   :  { %v2051_v1 = vadd.f32 %v907_v34, %v899_v33  ;;  %v1703_v33 = vpack.c.bf16 %v1218_v32, %v1217_v31 }
0x124b   :  { %1771 = vtanh.f32 %v2051_v1  ;;  %1704 = vmatpush3.bf16.msra.mxu0 %v1703_v33 }
0x1255   :  { %v1772_v38 = vpop.eup %1771 }
0x1256   :  { %912 = vrot.lane.b32.xlu1 %v1772_v38, %s1816_s16 }
0x12c8   :  { %v913_v43 = vpop.permute.xlu1 %912 }
0x12c9   :  { %v915_v44 = vmul.f32 %v1770_v30, %v913_v43 }
0x12cb   :  { %919 = vrot.lane.b32.xlu0 %v915_v44, %s1817_s7 }
0x133d   :  { %v920_v48 = vpop.permute.xlu0 %919 }
0x133e   :  { %1596 = vmatmul.mubr.msk.f32.vlgmr.msra.gmra.mrb[8].mxu1 %vm201_vm2, %v920_v48 }
0x133f   :  { %1698 = vmatpush3.bf16.msra.mxu1 %v1697_v47  ;;  %1613 = vmatprep.mubr.msk.f32.mxu1 %vm1814_vm1, %v1815_v10 }
0x1340   :  { %1705 = vmatprep.subr.bf16.mxu1 %v1813_v3 }
0x1342   :  { %1614 = vmatmul.mubr.msk.f32.vlgmr.msra.gmra.mrb[10].mxu1 %vm56_vm0, %v1978_v56 }
0x1343   :  { %1635 = vmatprep.mubr.msk.f32.mxu1 %vm1814_vm1, %v1815_v10  ;;  %v1421_v10 = vld [vmem:[%s2154_s2 + $0x8] sm:$0xff]  ;;  %1707 = vmatpush3.bf16.msra.mxu1 %v1706_v23 }
0x1344   :  { %1708 = vmatprep.subr.bf16.mxu1 %v1813_v3 }
0x1347   :  { %1710 = vmatpush3.bf16.msra.mxu1 %v1709_v28 }
0x1411   :  { %v989_v52 = vpop.f32.mrb[8].mxu1 }
0x1412   :  { %v993_v53 = vadd.f32 %v989_v52, %v183_v51  ;;  %v1597_v54 = vpop.f32.mrb[9].mxu1 }
0x1414   :  { %1773 = vtanh.f32 %v993_v53  ;;  %v1416_v0 = vmul.f32 -1.442695, %v993_v53 }
0x1415   :  { %v1169_v55 = vpop.f32.mrb[10].mxu1 }
0x1416   :  { %v1170_v58 = vadd.f32 %v1169_v55, %v1096_v49  ;;  %v1615_v59 = vpop.f32.mrb[11].mxu1 }
0x1418   :  { %v1180_v56 = vadd.f32 %v1420_v57, %v1170_v58 }
0x141a   :  { %1775 = vtanh.f32 %v1180_v56  ;;  %v1422_v61 = vmul.f32 -1.442695, %v1180_v56 }
0x141b   :  { %1777 = vpow2.f32 %v1416_v0 }
0x141c   :  { %1779 = vpow2.f32 %v1422_v61 }
0x141e   :  { %v1774_v60 = vpop.eup %1773 }
0x141f   :  { %1003 = vrot.lane.b32.xlu1 %v1774_v60, %s1816_s16 }
0x1423   :  { %1191 = vrot.lane.b32.xlu1 %v1421_v10, %s1816_s16 }
0x1424   :  { %v1776_v14 = vpop.eup %1775 }
0x1425   :  { %1196 = vrot.lane.b32.xlu0 %v1776_v14, %s1816_s16  ;;  %v1778_v63 = vpop.eup %1777 }
0x1426   :  { %v997_v2 = vadd.f32 1.0, %v1778_v63  ;;  %v1780_v4 = vpop.eup %1779 }
0x1427   :  { %v1186_v5 = vadd.f32 1.0, %v1780_v4 }
0x1428   :  { %1781 = vrcp.f32 %v997_v2 }
0x1429   :  { %1783 = vrcp.f32 %v1186_v5 }
0x1432   :  { %v1782_v6 = vpop.eup %1781 }
0x1433   :  { %v1784_v9 = vpop.eup %1783  ;;  %v1001_v15 = vmul.f32 %v1782_v6, %v2051_v1 }
0x1491   :  { %v1004_v8 = vpop.permute.xlu1 %1003 }
0x1492   :  { %v1006_v7 = vmul.f32 %v1782_v6, %v1004_v8 }
0x1494   :  { %1008 = vrot.lane.b32.xlu0 %v1006_v7, %s1816_s16 }
0x1495   :  { %v1192_v17 = vpop.permute.xlu1 %1191 }
0x1496   :  { %v1194_v62 = vmul.f32 %v1784_v9, %v1192_v17 }
0x1497   :  { %v1197_v11 = vpop.permute.xlu0 %1196 }
0x1498   :  { %v1199_v13 = vmul.f32 %v1784_v9, %v1197_v11 }
0x149a   :  { %1201 = vrot.lane.b32.xlu1 %v1199_v13, %s1816_s16 }
0x1506   :  { %v1009_v12 = vpop.permute.xlu0 %1008 }
0x1507   :  { %v1011_v16 = vadd.f32 %v1009_v12, %v1001_v15 }
0x1509   :  { %1785 = vtanh.f32 %v1011_v16 }
0x150c   :  { %v1202_v18 = vpop.permute.xlu1 %1201 }
0x150d   :  { %v1204_v19 = vadd.f32 %v1202_v18, %v1194_v62 }
0x150f   :  { %1787 = vtanh.f32 %v1204_v19 }
0x1513   :  { %v1786_v29 = vpop.eup %1785 }
0x1514   :  { %1014 = vrot.lane.b32.xlu0 %v1786_v29, %s1816_s16 }
0x1519   :  { %v1788_v30 = vpop.eup %1787 }
0x151a   :  { %1207 = vrot.lane.b32.xlu1 %v1788_v30, %s1816_s16 }
0x1586   :  { %v1015_v34 = vpop.permute.xlu0 %1014 }
0x1587   :  { %v1017_v1 = vmul.f32 %v1782_v6, %v1015_v34 }
0x1589   :  { %1295 = vrot.lane.b32.xlu1 %v1017_v1, %s1817_s7 }
0x158c   :  { %v1208_v35 = vpop.permute.xlu1 %1207 }
0x158d   :  { %v1210_v3 = vmul.f32 %v1784_v9, %v1208_v35 }
0x158f   :  { %1220 = vrot.lane.b32.xlu0 %v1210_v3, %s1817_s7  ;;  %s1789_s7 = scalar_lea.vmem %s1385_s19, 128 }
0x1590   :  { %p1790_p0 = scmp.ne.s32.totalorder %s1385_s19, %s1789_s7  ;;  %p1795_p2 = scmp.lt.s32.totalorder %s1789_s7, %s1789_s7 }
0x1592   :  { %p1796_p3 = por %p1795_p2, %p1794_p1 }
0x1594   :  { %p1797_p4 = pnand %p1796_p3, %p1790_p0 }
0x15fb   :  { %v1296_v36 = vpop.permute.xlu1 %1295 }
0x15fc   :  { %1636 = vmatmul.mubr.msk.f32.vlgmr.msra.gmra.mrb[12].mxu1 %vm201_vm2, %v1296_v36 }
0x1601   :  { %v1221_v37 = vpop.permute.xlu0 %1220 }
0x1602   :  { %1625 = vmatmul.mubr.msk.f32.vlgmr.msra.gmra.mrb[16].mxu0 %vm201_vm2, %v1221_v37 }
0x16cf   :  { %v1365_v38 = vpop.f32.mrb[12].mxu1 }
0x16d0   :  { %v1637_v39 = vpop.f32.mrb[13].mxu1 }
0x16d5   :  { %v1290_v40 = vpop.f32.mrb[16].mxu0 }
0x16d6   :  { %v1366_v42 = vadd.f32 %v1365_v38, %v1290_v40  ;;  %v1626_v43 = vpop.f32.mrb[17].mxu0 }
0x16d8   :  { %v1376_v44 = vadd.f32 %v1425_v41, %v1366_v42 }
0x16da   :  { %1377 = vst.msk [vmem:[#allocation3] sm:$0xff] %vm56_vm0, %v1376_v44 }
0x16db   :  { %1800 = shalt.err (!%p1797_p4)
}
0x16dc   :  { %s1801_s6 = scalar_lea.hbm %s2163_s11, 128 }
0x16dd   :  { %p1802_p5 = scmp.ne.s32.totalorder %s2163_s11, %s1801_s6  ;;  %p1805_p6 = scmp.lt.u32.totalorder %s1801_s6, %s2163_s11 }
0x16df   :  { %p1807_p7 = pnand %p1805_p6, %p1802_p5 }
0x16e1   :  { %1810 = shalt.err (!%p1807_p7)
}
0x16e2   :  { %1387 = dma.vmem_to_hbm [thread:$0]  %s1385_s19, 128, %s2163_s11, [#allocation4]  }
0x16e3   :  { %1811 = dma.done.wait [#allocation4], 128  }
0x16e4   :  { %1812 = vsyncadd [#allocation4], 4294967168 }
0x16e5   :  { %1391 = vsyncpa [#allocation4], 1 }

</bundles_post_ra>
